<compile_context>
chip_gen: v6e
topology: v6e:2x2x1
jax: 0.10.0
libtpu: 0.0.40
codegen_flags: <defaults>
</compile_context>

<pallas_src>
import math

import jax
import jax.numpy as jnp
from jax.experimental import pallas as pl
from jax.experimental.pallas import tpu as pltpu


def _pos_enc_add_kernel(x_ref, pe_ref, o_ref):
    # x_ref / o_ref: (TS, B*D); pe_ref: (TS, D).
    # Row-major flatten of (B, D) = B contiguous D-chunks along the lane dim,
    # so broadcasting pe over the batch is a static chunk loop (unrolled at
    # trace time) — no (TS, B*D) tiled copy of pe is ever materialized.
    d = pe_ref.shape[-1]
    reps = x_ref.shape[-1] // d          # == B, static at trace time
    pe_blk = pe_ref[...]
    for r in range(reps):                # static Python loop -> fully unrolled
        lo = r * d                       # static offset; lane-aligned when D % 128 == 0
        o_ref[:, lo:lo + d] = (x_ref[:, lo:lo + d] + pe_blk).astype(o_ref.dtype)


def make_positional_encoding_table(d_model: int, max_len: int = 5000) -> jnp.ndarray:
    """Deterministic PE buffer, shape (max_len, 1, d_model) like the PyTorch module."""
    assert d_model % 2 == 0, "PositionalEncoding requires an even d_model (same as the PyTorch module)."
    position = jnp.arange(0, max_len, dtype=jnp.float32)[:, None]            # (L, 1)
    div_term = jnp.exp(
        jnp.arange(0, d_model, 2, dtype=jnp.float32) * (-math.log(10000.0) / d_model)
    )                                                                         # (D/2,)
    args = position * div_term                                                # (L, D/2)
    pe = jnp.zeros((max_len, d_model), dtype=jnp.float32)
    pe = pe.at[:, 0::2].set(jnp.sin(args))
    pe = pe.at[:, 1::2].set(jnp.cos(args))
    return pe[:, None, :]                                                     # (L, 1, D)


def prepare_pe_table(pe: jnp.ndarray, dtype) -> jnp.ndarray:
    """One-time prep: (max_len, 1, D) or (max_len, D) -> (max_len, D) in `dtype`.

    Call once at model build time so the per-forward path has no slice/cast op."""
    if pe.ndim == 3:
        pe = pe[:, 0, :]
    return pe.astype(dtype)


def _vmem_budget_and_limit() -> tuple[int, int]:
    """Generation-aware VMEM budgeting (v5e/v6e: 128 MiB physical, v7x: 64 MiB)."""
    phys = 128 * 1024 * 1024
    try:
        info = pltpu.get_tpu_info()
        phys = int(getattr(info, "vmem_capacity_bytes", phys))
    except Exception:
        pass  # conservative fallback if the query is unavailable
    # Double-buffered working-set target: ~half of physical VMEM, capped at
    # 48 MiB (v5e/v6e -> 48 MiB, v7x -> 32 MiB), floor 8 MiB.
    budget = max(8 << 20, min(phys // 2, 48 << 20))
    # Scoped-VMEM limit handed to the compiler: budget + headroom, kept below
    # physical capacity (must exceed v5e's 16 MiB scoped default).
    limit = int(min(phys - (8 << 20), budget + (16 << 20)))
    return int(budget), limit


def _pick_tile_s(S: int, B: int, D: int, itemsize: int, vmem_budget_bytes: int) -> int:
    """Largest sublane tile (multiple of 8) whose double-buffered working set
    (x tile + out tile + pe tile) fits the budget, then capped so the grid has
    >= 2 (target 4) steps so the DMA pipeline has work in flight and v7x can
    shard the axis across both TensorCores."""
    bytes_per_row = (2 * B * D + D) * itemsize * 2   # x + out + pe, depth-2 buffering
    ts = (vmem_budget_bytes // max(bytes_per_row, 1)) // 8 * 8
    ts = max(8, ts)
    if S > 8:
        desired_steps = 4 if S >= 32 else 2
        cap = -(-S // desired_steps)                 # cdiv
        cap = ((cap + 7) // 8) * 8                   # round up to sublane multiple
        ts = min(ts, max(8, cap))
    return int(min(ts, S))


def positional_encoding_forward(x: jnp.ndarray, pe: jnp.ndarray,
                                *, block_s: int | None = None,
                                in_place: bool = False) -> jnp.ndarray:
    """x: (S, B, D).  pe: prepared (max_len, D) table (see prepare_pe_table) or
    the raw (max_len, 1, D) module buffer.  Returns x + pe[:S] (broadcast over B)."""
    S, B, D = x.shape
    if pe.ndim == 3:
        pe = pe[:, 0, :]
    if pe.dtype != x.dtype:
        # Fallback only — prefer prepare_pe_table() once at init; this cast is
        # an extra HBM pass if taken per call.
        pe = pe.astype(x.dtype)
    assert pe.shape[0] >= S and pe.shape[1] == D

    x2 = x.reshape(S, B * D)                         # lane-dense trailing dim
    budget, vmem_limit = _vmem_budget_and_limit()
    ts = _pick_tile_s(S, B, D, jnp.dtype(x.dtype).itemsize, budget)
    if block_s is not None:
        ts = int(min(ts, block_s))
    grid = (pl.cdiv(S, ts),)

    out = pl.pallas_call(
        _pos_enc_add_kernel,
        out_shape=jax.ShapeDtypeStruct((S, B * D), x.dtype),
        grid=grid,
        in_specs=[
            pl.BlockSpec((ts, B * D), lambda i: (i, 0)),   # x tile
            # Full (max_len, D) table is passed; only the row blocks the grid
            # touches are DMA'd, so no per-call slice op is needed.
            pl.BlockSpec((ts, D), lambda i: (i, 0)),
        ],
        out_specs=pl.BlockSpec((ts, B * D), lambda i: (i, 0)),
        # When the caller donates x (e.g. jit(..., donate_argnums)), write the
        # result in place over x's buffer; off by default so non-donated
        # callers don't pay a defensive copy.
        input_output_aliases={0: 0} if in_place else {},
        compiler_params=pltpu.CompilerParams(
            dimension_semantics=("parallel",),   # independent tiles; shards across TCs on v7x
            vmem_limit_bytes=vmem_limit,
        ),
    )(x2, pe)
    return out.reshape(S, B, D)


if __name__ == "__main__":
    # --- small shapes matching the module's forward (S, B, D) ---
    d_model = 32
    seq_len = 8
    batch = 2
    max_len = 64

    key = jax.random.PRNGKey(0)
    x = jax.random.normal(key, (seq_len, batch, d_model), dtype=jnp.float32)
    pe_buf = make_positional_encoding_table(d_model, max_len)   # (L, 1, D), like the module buffer
    pe_tab = prepare_pe_table(pe_buf, x.dtype)                  # one-time prep (no per-call slice/cast)

    out = jax.block_until_ready(positional_encoding_forward(x, pe_tab))
    ref = x + pe_buf[:seq_len]
    assert out.shape == (seq_len, batch, d_model)
    assert jnp.allclose(out, ref, atol=1e-6, rtol=1e-6)

    # --- second check: multi-tile pipelined path, lane-aligned D, and a
    #     partial last tile (S not divisible by the chosen tile) ---
    d_model2, seq2, batch2 = 128, 200, 4
    x2 = jax.random.normal(jax.random.PRNGKey(1), (seq2, batch2, d_model2), dtype=jnp.float32)
    pe_buf2 = make_positional_encoding_table(d_model2, max_len=512)
    pe_tab2 = prepare_pe_table(pe_buf2, x2.dtype)
    out2 = jax.block_until_ready(positional_encoding_forward(x2, pe_tab2))
    ref2 = x2 + pe_buf2[:seq2]
    assert jnp.allclose(out2, ref2, atol=1e-6, rtol=1e-6)

    print("KERNEL_OK")
</pallas_src>

<mosaic_0001>
module attributes {stable_mosaic.version = 11 : i64} {
  func.func @_pos_enc_add_kernel(%arg0: i32, %arg1: memref<8x64xf32, #tpu.memory_space<vmem>>, %arg2: memref<8x32xf32, #tpu.memory_space<vmem>>, %arg3: memref<8x64xf32, #tpu.memory_space<vmem>>) attributes {dimension_semantics = [#tpu.dimension_semantics<parallel>], iteration_bounds = array<i64: 1>, scalar_prefetch = 0 : i64, scratch_operands = 0 : i64, tpu.core_type = #tpu.core_type<tc>, window_params = [{transform_indices = @transform_0, window_bounds = array<i64: 8, 64>}, {transform_indices = @transform_1, window_bounds = array<i64: 8, 32>}, {transform_indices = @transform_2, window_bounds = array<i64: 8, 64>}]} {
    %c0 = arith.constant 0 : index
    %c0_0 = arith.constant 0 : index
    %0 = vector.load %arg2[%c0, %c0_0] : memref<8x32xf32, #tpu.memory_space<vmem>>, vector<8x32xf32>
    %c0_1 = arith.constant 0 : index
    %c0_2 = arith.constant 0 : index
    %1 = vector.load %arg1[%c0_1, %c0_2] : memref<8x64xf32, #tpu.memory_space<vmem>>, vector<8x32xf32>
    %2 = arith.addf %1, %0 : vector<8x32xf32>
    %c0_3 = arith.constant 0 : index
    %c0_4 = arith.constant 0 : index
    %3 = vector.load %arg3[%c0_3, %c0_4] : memref<8x64xf32, #tpu.memory_space<vmem>>, vector<8x32xf32>
    tpu.vector_store %arg3[%c0_3, %c0_4], %2 {strides = array<i32>} : memref<8x64xf32, #tpu.memory_space<vmem>>, vector<8x32xf32>,
    %c0_5 = arith.constant 0 : index
    %c32 = arith.constant 32 : index
    %4 = vector.load %arg1[%c0_5, %c32] : memref<8x64xf32, #tpu.memory_space<vmem>>, vector<8x32xf32>
    %5 = arith.addf %4, %0 : vector<8x32xf32>
    %c0_6 = arith.constant 0 : index
    %c32_7 = arith.constant 32 : index
    %6 = vector.load %arg3[%c0_6, %c32_7] : memref<8x64xf32, #tpu.memory_space<vmem>>, vector<8x32xf32>
    tpu.vector_store %arg3[%c0_6, %c32_7], %5 {strides = array<i32>} : memref<8x64xf32, #tpu.memory_space<vmem>>, vector<8x32xf32>,
    return
  }
  func.func @transform_0(%arg0: i32) -> (i32, i32) {
    %c0_i32 = arith.constant 0 : i32
    %c0_i32_0 = arith.constant 0 : i32
    return %arg0, %c0_i32 : i32, i32
  }
  func.func @transform_1(%arg0: i32) -> (i32, i32) {
    %c0_i32 = arith.constant 0 : i32
    %c0_i32_0 = arith.constant 0 : i32
    return %arg0, %c0_i32 : i32, i32
  }
  func.func @transform_2(%arg0: i32) -> (i32, i32) {
    %c0_i32 = arith.constant 0 : i32
    %c0_i32_0 = arith.constant 0 : i32
    return %arg0, %c0_i32 : i32, i32
  }
}

</mosaic_0001>

<bundles_post_ra>
// kernel: tpu_custom_call.1
= control target key start
LH: loop header
LB: loop body
LE: loop exit
PB: predicated region body
PF: predicated region fallthrough
CT: control target
= control target key end

     0   :  { %vm15_vm0 = vcmask 261120   ;;  %s89_s0 = inlined_call_operand.vmem [shape: f32[8,64], index: 0, kind: input, shape index: {}]   ;;  %s90_s1 = inlined_call_operand.vmem [shape: f32[64,32], index: 1, kind: input, shape index: {}]   ;;  %s91_s2 = inlined_call_operand.hbm [shape: f32[8,64], index: 2, kind: output, shape index: {}]  }
   0x1   :  { %v12_v0 = vld [vmem:[%s90_s1] sm:$0xff] }
   0x2   :  { %v13_v1 = vld [vmem:[%s89_s0] sm:$0xff] }
   0x3   :  { %7 = vsyncpa [#allocation3], 0  ;;  %v14_v2 = vadd.f32 %v13_v1, %v12_v0  ;;  %s63_s13 = smov 32   ;;  %s64_s14 = smov [#allocation2]   ;;  %vm23_vm1 = vcmask 523520  }
   0x4   :  { %19 = vrot.lane.b32.xlu0 %v12_v0, %s63_s13  ;;  %s31_s15 = sshll.u32 %s64_s14, 4  ;;  %s32_s15 = int_to_ptr.vmem [resolvable:$true] %s31_s15 }
   0x5   :  { %16 = vst.msk [vmem:[#allocation2] sm:$0xff] %vm15_vm0, %v14_v2  ;;  %s41_s16 = scalar_lea.vmem %s32_s15, 128  ;;  %p46_p1 = scmp.lt.s32.totalorder %s32_s15, %s32_s15 }
   0x6   :  { %p42_p0 = scmp.ne.s32.totalorder %s32_s15, %s41_s16  ;;  %p47_p2 = scmp.lt.s32.totalorder %s41_s16, %s41_s16 }
   0x8   :  { %p48_p3 = por %p47_p2, %p46_p1 }
   0xa   :  { %p49_p4 = pnand %p48_p3, %p42_p0 }
  0x76   :  { %v20_v3 = vpop.permute.xlu0 %19 }
  0x77   :  { %v22_v4 = vadd.f32 %v20_v3, %v13_v1 }
  0x79   :  { %24 = vst.msk [vmem:[#allocation2] sm:$0xff] %vm23_vm1, %v22_v4 }
  0x7a   :  { %52 = shalt.err (!%p49_p4)
}
  0x7b   :  { %34 = dma.vmem_to_hbm [thread:$0]  %s32_s15, 128, %s91_s2, [#allocation3]  }
  0x7c   :  { %61 = dma.done.wait [#allocation3], 128  }
  0x7d   :  { %62 = vsyncadd [#allocation3], 4294967168 }
  0x7e   :  { %38 = vsyncpa [#allocation3], 1 }

</bundles_post_ra>
